<compile_context>
chip_gen: v5e
topology: v5e:2x2
jax: 0.10.0
libtpu: 0.0.40
codegen_flags: <defaults>
</compile_context>

<pallas_src>
import functools

import jax
import jax.numpy as jnp
from jax.experimental import pallas as pl
from jax.experimental.pallas import tpu as pltpu


def _round_up(x, m):
    return (x + m - 1) // m * m


def _rsoftmax_kernel(radix, cardinality, rest, x_ref, o_ref):
    """Softmax over the radix groups on flat 2D blocks.

    x_ref: (TB, C) in native fc2 flat order:  (c, r, j) -> lane c*radix*rest + r*rest + j
    o_ref: (TB, C) in transposed flat order:  (r, c, j) -> lane r*card*rest  + c*rest + j
    """
    x = x_ref[...].astype(jnp.float32)
    for c in range(cardinality):
        xs = [x[:, (c * radix + r) * rest:(c * radix + r + 1) * rest]
              for r in range(radix)]
        if radix == 2:
            # softmax over 2 elements: p0 = sigmoid(x0 - x1); one exp, no max pass.
            p0 = pl.reciprocal(1.0 + jnp.exp(xs[1] - xs[0]), approx=False)
            ps = [p0, 1.0 - p0]
        else:
            m = xs[0]
            for xr in xs[1:]:
                m = jnp.maximum(m, xr)
            es = [jnp.exp(xr - m) for xr in xs]
            s = es[0]
            for er in es[1:]:
                s = s + er
            inv = pl.reciprocal(s, approx=False)  # exact: 1e-5 test tolerance
            ps = [er * inv for er in es]
        for r in range(radix):
            lo = (r * cardinality + c) * rest
            o_ref[:, lo:lo + rest] = ps[r].astype(o_ref.dtype)


def _sigmoid_kernel(x_ref, o_ref):
    x = x_ref[...].astype(jnp.float32)
    o_ref[...] = pl.reciprocal(1.0 + jnp.exp(-x), approx=False).astype(o_ref.dtype)


def _pick_tb(batch, channels, budget=2 << 20):
    """Rows per grid step.

    Targets a ~2 MiB block (so in+out double-buffered + f32 temps fit the
    default scoped VMEM on v5e/v6e/v7x), accounts for lane padding, and uses
    cdiv-balanced blocks instead of a divisor search (no prime-B collapse).
    """
    lane_bytes = _round_up(channels, 128) * 4        # f32 working width, lane-padded
    row_bytes = lane_bytes * 4                       # in + out + ~2 live f32 temps
    tb_max = min(batch, max(1, budget // row_bytes))
    tb = pl.cdiv(batch, pl.cdiv(batch, tb_max))      # even-ish blocks
    return tb


def rsoftmax(x, radix, cardinality):
    """Pallas implementation of rSoftMax.forward.

    x: (B, C, H, W) array (NCHW, typically H=W=1 as produced by fc2).
    radix > 1  -> returns (B, C*H*W), softmax over the radix groups.
    radix == 1 -> returns sigmoid(x) with the input shape (PyTorch semantics).
    """
    B = x.shape[0]
    C = 1
    for d in x.shape[1:]:
        C *= d
    xf = x.reshape(B, C)                 # free: memory order unchanged

    tb = _pick_tb(B, C)
    grid = (pl.cdiv(B, tb),)
    params = pltpu.CompilerParams(dimension_semantics=("parallel",))

    if radix > 1:
        assert C % (cardinality * radix) == 0
        rest = C // (cardinality * radix)
        out = pl.pallas_call(
            functools.partial(_rsoftmax_kernel, radix, cardinality, rest),
            out_shape=jax.ShapeDtypeStruct((B, C), x.dtype),
            grid=grid,
            in_specs=[pl.BlockSpec((tb, C), lambda i: (i, 0))],
            out_specs=pl.BlockSpec((tb, C), lambda i: (i, 0)),
            compiler_params=params,
        )(xf)
        return out                       # already flat (B, C) in transposed order

    out = pl.pallas_call(
        _sigmoid_kernel,
        out_shape=jax.ShapeDtypeStruct((B, C), x.dtype),
        grid=grid,
        in_specs=[pl.BlockSpec((tb, C), lambda i: (i, 0))],
        out_specs=pl.BlockSpec((tb, C), lambda i: (i, 0)),
        compiler_params=params,
    )(xf)
    return out.reshape(x.shape)


def _reference_rsoftmax(x, radix, cardinality):
    B = x.shape[0]
    if radix > 1:
        xr = x.reshape(B, cardinality, radix, -1)
        xr = jnp.transpose(xr, (0, 2, 1, 3))
        xr = jax.nn.softmax(xr, axis=1)
        return xr.reshape(B, -1)
    return jax.nn.sigmoid(x)


if __name__ == "__main__":
    key = jax.random.PRNGKey(0)
    k1, k2, k3, k4 = jax.random.split(key, 4)

    # --- radix == 2, cardinality > 1 (fast sigmoid path, transposed layout) ---
    batch, radix, cardinality, rest = 2, 2, 4, 16
    C = radix * cardinality * rest                      # 128 channels
    x = jax.random.normal(k1, (batch, C, 1, 1), dtype=jnp.float32)
    y = jax.block_until_ready(rsoftmax(x, radix, cardinality))
    y_ref = _reference_rsoftmax(x, radix, cardinality)
    assert y.shape == (batch, C)
    assert jnp.allclose(y, y_ref, atol=1e-5, rtol=1e-5)

    # --- radix == 2, cardinality == 1 (typical ResNeSt config) ----------------
    b2, r2, c2, rest2 = 4, 2, 1, 64
    C2 = r2 * c2 * rest2
    x2 = jax.random.normal(k2, (b2, C2, 1, 1), dtype=jnp.float32)
    y2 = jax.block_until_ready(rsoftmax(x2, r2, c2))
    y2_ref = _reference_rsoftmax(x2, r2, c2)
    assert y2.shape == (b2, C2)
    assert jnp.allclose(y2, y2_ref, atol=1e-5, rtol=1e-5)

    # --- radix == 4 (general max-subtracted softmax path) ---------------------
    b3, r3, c3, rest3 = 2, 4, 2, 32
    C3 = r3 * c3 * rest3
    x3 = jax.random.normal(k3, (b3, C3, 1, 1), dtype=jnp.float32)
    y3 = jax.block_until_ready(rsoftmax(x3, r3, c3))
    y3_ref = _reference_rsoftmax(x3, r3, c3)
    assert y3.shape == (b3, C3)
    assert jnp.allclose(y3, y3_ref, atol=1e-5, rtol=1e-5)

    # --- radix == 1 (sigmoid, keeps NCHW shape) --------------------------------
    x4 = jax.random.normal(k4, (2, 64, 1, 1), dtype=jnp.float32)
    y4 = jax.block_until_ready(rsoftmax(x4, 1, 4))
    y4_ref = jax.nn.sigmoid(x4)
    assert y4.shape == x4.shape
    assert jnp.allclose(y4, y4_ref, atol=1e-5, rtol=1e-5)

    print("KERNEL_OK")
</pallas_src>

<mosaic_0001>
module attributes {stable_mosaic.version = 11 : i64} {
  func.func @_rsoftmax_kernel(%arg0: i32, %arg1: memref<2x128xf32, #tpu.memory_space<vmem>>, %arg2: memref<2x128xf32, #tpu.memory_space<vmem>>) attributes {dimension_semantics = [#tpu.dimension_semantics<parallel>], iteration_bounds = array<i64: 1>, scalar_prefetch = 0 : i64, scratch_operands = 0 : i64, tpu.core_type = #tpu.core_type<tc>, window_params = [{transform_indices = @transform_0, window_bounds = array<i64: 2, 128>}, {transform_indices = @transform_1, window_bounds = array<i64: 2, 128>}]} {
    %c0 = arith.constant 0 : index
    %c0_0 = arith.constant 0 : index
    %0 = vector.load %arg1[%c0, %c0_0] : memref<2x128xf32, #tpu.memory_space<vmem>>, vector<2x128xf32>
    %1 = vector.extract_strided_slice %0 {offsets = [0, 0], sizes = [2, 16], strides = [1, 1]} : vector<2x128xf32> to vector<2x16xf32>
    %2 = vector.extract_strided_slice %0 {offsets = [0, 16], sizes = [2, 16], strides = [1, 1]} : vector<2x128xf32> to vector<2x16xf32>
    %3 = arith.subf %2, %1 : vector<2x16xf32>
    %4 = math.exp %3 : vector<2x16xf32>
    %cst = arith.constant 1.000000e+00 : f32
    %5 = vector.broadcast %cst : f32 to vector<2x16xf32>
    %6 = arith.addf %5, %4 : vector<2x16xf32>
    %7 = tpu.reciprocal %6 : vector<2x16xf32> -> vector<2x16xf32>
    %cst_1 = arith.constant 1.000000e+00 : f32
    %8 = vector.broadcast %cst_1 : f32 to vector<2x16xf32>
    %9 = arith.subf %8, %7 : vector<2x16xf32>
    %c0_2 = arith.constant 0 : index
    %c0_3 = arith.constant 0 : index
    %10 = vector.load %arg2[%c0_2, %c0_3] : memref<2x128xf32, #tpu.memory_space<vmem>>, vector<2x16xf32>
    tpu.vector_store %arg2[%c0_2, %c0_3], %7 {strides = array<i32>} : memref<2x128xf32, #tpu.memory_space<vmem>>, vector<2x16xf32>,
    %c0_4 = arith.constant 0 : index
    %c64 = arith.constant 64 : index
    %11 = vector.load %arg2[%c0_4, %c64] : memref<2x128xf32, #tpu.memory_space<vmem>>, vector<2x16xf32>
    tpu.vector_store %arg2[%c0_4, %c64], %9 {strides = array<i32>} : memref<2x128xf32, #tpu.memory_space<vmem>>, vector<2x16xf32>,
    %12 = vector.extract_strided_slice %0 {offsets = [0, 32], sizes = [2, 16], strides = [1, 1]} : vector<2x128xf32> to vector<2x16xf32>
    %13 = vector.extract_strided_slice %0 {offsets = [0, 48], sizes = [2, 16], strides = [1, 1]} : vector<2x128xf32> to vector<2x16xf32>
    %14 = arith.subf %13, %12 : vector<2x16xf32>
    %15 = math.exp %14 : vector<2x16xf32>
    %cst_5 = arith.constant 1.000000e+00 : f32
    %16 = vector.broadcast %cst_5 : f32 to vector<2x16xf32>
    %17 = arith.addf %16, %15 : vector<2x16xf32>
    %18 = tpu.reciprocal %17 : vector<2x16xf32> -> vector<2x16xf32>
    %cst_6 = arith.constant 1.000000e+00 : f32
    %19 = vector.broadcast %cst_6 : f32 to vector<2x16xf32>
    %20 = arith.subf %19, %18 : vector<2x16xf32>
    %c0_7 = arith.constant 0 : index
    %c16 = arith.constant 16 : index
    %21 = vector.load %arg2[%c0_7, %c16] : memref<2x128xf32, #tpu.memory_space<vmem>>, vector<2x16xf32>
    tpu.vector_store %arg2[%c0_7, %c16], %18 {strides = array<i32>} : memref<2x128xf32, #tpu.memory_space<vmem>>, vector<2x16xf32>,
    %c0_8 = arith.constant 0 : index
    %c80 = arith.constant 80 : index
    %22 = vector.load %arg2[%c0_8, %c80] : memref<2x128xf32, #tpu.memory_space<vmem>>, vector<2x16xf32>
    tpu.vector_store %arg2[%c0_8, %c80], %20 {strides = array<i32>} : memref<2x128xf32, #tpu.memory_space<vmem>>, vector<2x16xf32>,
    %23 = vector.extract_strided_slice %0 {offsets = [0, 64], sizes = [2, 16], strides = [1, 1]} : vector<2x128xf32> to vector<2x16xf32>
    %24 = vector.extract_strided_slice %0 {offsets = [0, 80], sizes = [2, 16], strides = [1, 1]} : vector<2x128xf32> to vector<2x16xf32>
    %25 = arith.subf %24, %23 : vector<2x16xf32>
    %26 = math.exp %25 : vector<2x16xf32>
    %cst_9 = arith.constant 1.000000e+00 : f32
    %27 = vector.broadcast %cst_9 : f32 to vector<2x16xf32>
    %28 = arith.addf %27, %26 : vector<2x16xf32>
    %29 = tpu.reciprocal %28 : vector<2x16xf32> -> vector<2x16xf32>
    %cst_10 = arith.constant 1.000000e+00 : f32
    %30 = vector.broadcast %cst_10 : f32 to vector<2x16xf32>
    %31 = arith.subf %30, %29 : vector<2x16xf32>
    %c0_11 = arith.constant 0 : index
    %c32 = arith.constant 32 : index
    %32 = vector.load %arg2[%c0_11, %c32] : memref<2x128xf32, #tpu.memory_space<vmem>>, vector<2x16xf32>
    tpu.vector_store %arg2[%c0_11, %c32], %29 {strides = array<i32>} : memref<2x128xf32, #tpu.memory_space<vmem>>, vector<2x16xf32>,
    %c0_12 = arith.constant 0 : index
    %c96 = arith.constant 96 : index
    %33 = vector.load %arg2[%c0_12, %c96] : memref<2x128xf32, #tpu.memory_space<vmem>>, vector<2x16xf32>
    tpu.vector_store %arg2[%c0_12, %c96], %31 {strides = array<i32>} : memref<2x128xf32, #tpu.memory_space<vmem>>, vector<2x16xf32>,
    %34 = vector.extract_strided_slice %0 {offsets = [0, 96], sizes = [2, 16], strides = [1, 1]} : vector<2x128xf32> to vector<2x16xf32>
    %35 = vector.extract_strided_slice %0 {offsets = [0, 112], sizes = [2, 16], strides = [1, 1]} : vector<2x128xf32> to vector<2x16xf32>
    %36 = arith.subf %35, %34 : vector<2x16xf32>
    %37 = math.exp %36 : vector<2x16xf32>
    %cst_13 = arith.constant 1.000000e+00 : f32
    %38 = vector.broadcast %cst_13 : f32 to vector<2x16xf32>
    %39 = arith.addf %38, %37 : vector<2x16xf32>
    %40 = tpu.reciprocal %39 : vector<2x16xf32> -> vector<2x16xf32>
    %cst_14 = arith.constant 1.000000e+00 : f32
    %41 = vector.broadcast %cst_14 : f32 to vector<2x16xf32>
    %42 = arith.subf %41, %40 : vector<2x16xf32>
    %c0_15 = arith.constant 0 : index
    %c48 = arith.constant 48 : index
    %43 = vector.load %arg2[%c0_15, %c48] : memref<2x128xf32, #tpu.memory_space<vmem>>, vector<2x16xf32>
    tpu.vector_store %arg2[%c0_15, %c48], %40 {strides = array<i32>} : memref<2x128xf32, #tpu.memory_space<vmem>>, vector<2x16xf32>,
    %c0_16 = arith.constant 0 : index
    %c112 = arith.constant 112 : index
    %44 = vector.load %arg2[%c0_16, %c112] : memref<2x128xf32, #tpu.memory_space<vmem>>, vector<2x16xf32>
    tpu.vector_store %arg2[%c0_16, %c112], %42 {strides = array<i32>} : memref<2x128xf32, #tpu.memory_space<vmem>>, vector<2x16xf32>,
    return
  }
  func.func @transform_0(%arg0: i32) -> (i32, i32) {
    %c0_i32 = arith.constant 0 : i32
    %c0_i32_0 = arith.constant 0 : i32
    return %arg0, %c0_i32 : i32, i32
  }
  func.func @transform_1(%arg0: i32) -> (i32, i32) {
    %c0_i32 = arith.constant 0 : i32
    %c0_i32_0 = arith.constant 0 : i32
    return %arg0, %c0_i32 : i32, i32
  }
}

</mosaic_0001>

<bundles_post_ra>
// kernel: tpu_custom_call.1
= control target key start
LH: loop header
LB: loop body
LE: loop exit
PB: predicated region body
PF: predicated region fallthrough
CT: control target
= control target key end

     0   :  { %6 = vsyncpa [#allocation3], 0  ;;  %s195_s0 = inlined_call_operand.hbm [shape: f32[2,128], index: 0, kind: input, shape index: {}]   ;;  %s196_s1 = inlined_call_operand.hbm [shape: f32[2,128], index: 1, kind: output, shape index: {}]  }
   0x1   :  { %7 = vsyncpa [#allocation4], 0  ;;  %s13_s8 = sshll.u32 %s195_s0, 4  ;;  %s168_s9 = smov [#allocation2]   ;;  %s14_s8 = int_to_ptr.hbm [resolvable:$true] %s13_s8 }
   0x2   :  { %s15_s10 = sshll.u32 %s168_s9, 4  ;;  %s16_s10 = int_to_ptr.vmem [resolvable:$true] %s15_s10 }
   0x3   :  { %18 = dma.hbm_to_vmem [thread:$0]  %s14_s8, 32, %s16_s10, [#allocation3]  }
   0x4   :  { %164 = dma.done.wait [#allocation3], 32  }
   0x5   :  { %165 = vsyncadd [#allocation3], 4294967264  ;;  %v23_v0 = vld [vmem:[#allocation2] sm:$0x3]  ;;  %s169_s11 = smov 16   ;;  %s170_s0 = smov 96  }
   0x6   :  { %25 = vrot.lane.b32.xlu0 %v23_v0, %s169_s11  ;;  %s171_s12 = smov 112   ;;  %s172_s13 = smov 32   ;;  %vm51_vm4 = vcmask 123904   ;;  %vm57_vm5 = vcmask 648704   ;;  %vm62_vm6 = vcmask 255104   ;;  %vm67_vm7 = vcmask 779904  }
   0x7   :  { %s173_s14 = smov 48   ;;  %s174_s15 = smov 80   ;;  %vm72_vm8 = vcmask 386304   ;;  %vm77_vm9 = vcmask 911104   ;;  %vm82_vm10 = vcmask 517504   ;;  %vm84_vm11 = vcmask 1042304  }
   0x8   :  { %s175_s16 = smov 64   ;;  %s176_s17 = smov [#allocation5]  }
   0x9   :  { %s91_s18 = sshll.u32 %s176_s17, 4  ;;  %s93_s21 = sshll.u32 %s196_s1, 4  ;;  %s92_s18 = int_to_ptr.vmem [resolvable:$true] %s91_s18  ;;  %s94_s21 = int_to_ptr.hbm [resolvable:$true] %s93_s21 }
  0x78   :  { %v26_v1 = vpop.permute.xlu0 %25 }
  0x79   :  { %v28_v2 = vsub.f32 %v23_v0, %v26_v1 }
  0x7b   :  { %v29_v3 = vmul.f32 1.442695, %v28_v2 }
  0x7d   :  { %112 = vpow2.f32 %v29_v3 }
  0x83   :  { %v113_v4 = vpop.eup %112 }
  0x84   :  { %v31_v5 = vadd.f32 1.0, %v113_v4 }
  0x86   :  { %114 = vrcp.f32 %v31_v5  ;;  %v43_v9 = vand.u32 2147483648, %v31_v5  ;;  %v41_v11 = vand.u32 2147483647, %v31_v5  ;;  %vm37_vm1 = vweird.f32 %v31_v5 }
  0x88   :  { %v44_v13 = vor.u32 1.1754944e-38, %v43_v9  ;;  %vm42_vm3 = vcmp.eq.f32.partialorder %v41_v11, 8.507059e+37 }
  0x8c   :  { %v115_v6 = vpop.eup %114 }
  0x8d   :  { %v33_v7 = vmul.f32 %v115_v6, %v31_v5  ;;  %vm38_vm0 = vweird.f32 %v115_v6 }
  0x8e   :  { %vm39_vm2 = vmor %vm37_vm1, %vm38_vm0 }
  0x8f   :  { %v34_v8 = vsub.f32 1.0, %v33_v7 }
  0x91   :  { %v35_v10 = vmul.f32 %v115_v6, %v34_v8 }
  0x93   :  { %v36_v12 = vadd.f32 %v115_v6, %v35_v10 }
  0x95   :  { %v40_v14 = vsel %vm39_vm2, %v115_v6, %v36_v12 }
  0x96   :  { %v45_v15 = vsel %vm42_vm3, %v44_v13, %v40_v14 }
  0x97   :  { %59 = vrot.lane.b32.xlu1 %v45_v15, %s170_s0  ;;  %48 = vrot.lane.b32.xlu0 %v45_v15, %s171_s12  ;;  %v46_v16 = vsub.f32 1.0, %v45_v15 }
  0x99   :  { %64 = vrot.lane.b32.xlu2 %v46_v16, %s172_s13 }
  0x9f   :  { %74 = vrot.lane.b32.xlu0 %v46_v16, %s169_s11  ;;  %54 = vrot.lane.b32.xlu1 %v46_v16, %s173_s14 }
  0xa1   :  { %69 = vrot.lane.b32.xlu2 %v45_v15, %s174_s15 }
  0xa7   :  { %79 = vrot.lane.b32.xlu1 %v45_v15, %s175_s16 }
  0xf3   :  { %v65_v19 = vpop.permute.xlu2 %64 }
  0xfb   :  { %v70_v21 = vpop.permute.xlu2 %69 }
 0x109   :  { %v60_v17 = vpop.permute.xlu1 %59  ;;  %v49_v18 = vpop.permute.xlu0 %48 }
 0x10a   :  { %52 = vst.msk [vmem:[#allocation5] sm:$0x3] %vm51_vm4, %v49_v18 }
 0x111   :  { %v55_v20 = vpop.permute.xlu1 %54  ;;  %v75_v22 = vpop.permute.xlu0 %74 }
 0x112   :  { %58 = vst.msk [vmem:[#allocation5] sm:$0x3] %vm57_vm5, %v55_v20 }
 0x113   :  { %63 = vst.msk [vmem:[#allocation5] sm:$0x3] %vm62_vm6, %v60_v17 }
 0x114   :  { %68 = vst.msk [vmem:[#allocation5] sm:$0x3] %vm67_vm7, %v65_v19 }
 0x115   :  { %73 = vst.msk [vmem:[#allocation5] sm:$0x3] %vm72_vm8, %v70_v21 }
 0x116   :  { %78 = vst.msk [vmem:[#allocation5] sm:$0x3] %vm77_vm9, %v75_v22 }
 0x119   :  { %v80_v23 = vpop.permute.xlu1 %79 }
 0x11a   :  { %83 = vst.msk [vmem:[#allocation5] sm:$0x3] %vm82_vm10, %v80_v23 }
 0x11b   :  { %85 = vst.msk [vmem:[#allocation5] sm:$0x3] %vm84_vm11, %v46_v16 }
 0x11c   :  { %96 = dma.vmem_to_hbm [thread:$0]  %s92_s18, 32, %s94_s21, [#allocation4]  }
 0x11d   :  { %166 = dma.done.wait [#allocation4], 32  }
 0x11e   :  { %167 = vsyncadd [#allocation4], 4294967264 }
 0x11f   :  { %101 = vsyncpa [#allocation3], 1 }
 0x120   :  { %102 = vsyncpa [#allocation4], 1 }

</bundles_post_ra>
